<compile_context>
chip_gen: v5e
topology: v5e:2x2
jax: 0.10.0
libtpu: 0.0.40
codegen_flags: <defaults>
</compile_context>

<pallas_src>
from functools import partial

import jax
import jax.numpy as jnp
from jax.experimental import pallas as pl
from jax.experimental.pallas import tpu as pltpu

_LANE = 128  # vreg lane width


def _round_up(x, m):
    return (x + m - 1) // m * m


def _qnet_kernel(x_ref, w1_ref, b1_ref, w2_ref, b2_ref, o_ref):
    # h = relu(x @ W1 + b1)   -- MXU matmul, f32 accumulate; elementwise in f32
    h = jnp.dot(x_ref[...], w1_ref[...], preferred_element_type=jnp.float32)
    h = jnp.maximum(h + b1_ref[...], 0.0)
    # y = h @ W2 + b2         -- cast h to weight dtype (no-op for f32 path)
    y = jnp.dot(h.astype(w2_ref.dtype), w2_ref[...],
                preferred_element_type=jnp.float32)
    o_ref[...] = (y + b2_ref[...]).astype(o_ref.dtype)


def prepare_params(w1, b1, w2, b2, *, use_bf16=True):
    """One-time padding / casting of parameters (hoisted out of the forward).

    w1: [input_size, hidden]  (transpose of torch linear1.weight)
    b1: [1, hidden]
    w2: [hidden, output]      (transpose of torch linear2.weight)
    b2: [1, output]
    """
    in_size, hidden = w1.shape
    out_size = w2.shape[1]
    granule = 16 if use_bf16 else 8            # bf16 packs 16 sublanes, f32 packs 8
    in_p = _round_up(in_size, granule)         # K dim of first matmul
    hid_p = _round_up(hidden, _LANE)           # lane-dense hidden
    w_dt = jnp.bfloat16 if use_bf16 else jnp.float32

    w1p = jnp.zeros((in_p, hid_p), w_dt).at[:in_size, :hidden].set(w1.astype(w_dt))
    b1p = jnp.zeros((1, hid_p), jnp.float32).at[:, :hidden].set(b1.astype(jnp.float32))
    # NOTE: output dim is intentionally NOT padded to 128 lanes (narrow store).
    w2p = jnp.zeros((hid_p, out_size), w_dt).at[:hidden, :].set(w2.astype(w_dt))
    b2p = b2.astype(jnp.float32).reshape(1, out_size)
    return w1p, b1p, w2p, b2p


@partial(jax.jit, static_argnames=("block_b",))
def linear_qnet_forward(x, w1p, b1p, w2p, b2p, block_b=1024):
    """Fused forward pass: relu(x @ W1 + b1) @ W2 + b2.

    x is [B, input_size] float32; params come from prepare_params().
    Returns [B, output_size] float32.
    """
    B, in_size = x.shape
    in_p, hid_p = w1p.shape
    out_size = w2p.shape[1]
    x_dt = w1p.dtype                              # matmul operand dtype (f32 or bf16)
    granule = 16 if x_dt == jnp.bfloat16 else 8

    # Batch tiling: >=2 grid steps when B allows (engages both v7x TCs),
    # large tiles otherwise to amortize per-step overhead.
    tb = min(block_b, _round_up(pl.cdiv(B, 2), granule))
    b_pad = _round_up(B, granule)                 # tiny pad (<= granule-1 rows)
    grid = (pl.cdiv(B, tb),)                      # partial last block handled by Pallas

    # Single tiny fused pad+cast of x (feature dim to granule, batch to granule).
    xp = jnp.zeros((b_pad, in_p), x_dt).at[:B, :in_size].set(x.astype(x_dt))

    # VMEM budget from actual footprint (v7x is the binding generation: 64 MiB
    # physical / 32 MiB scoped default).  2x headroom, clamped to [4, 32] MiB.
    itm = x_dt.itemsize
    streamed = 2 * tb * (in_p * itm + out_size * 4)                 # dbl-buffered x / out tiles
    resident = 2 * (in_p * hid_p * itm + hid_p * 4
                    + hid_p * out_size * itm + out_size * 4)        # weights / biases
    scratch = tb * hid_p * 4 + tb * out_size * 4                    # h, y intermediates (f32)
    vmem_limit = int(min(32 << 20, max(4 << 20, 2 * (streamed + resident + scratch))))

    out = pl.pallas_call(
        _qnet_kernel,
        out_shape=jax.ShapeDtypeStruct((b_pad, out_size), jnp.float32),
        grid_spec=pltpu.PrefetchScalarGridSpec(
            num_scalar_prefetch=0,
            grid=grid,
            in_specs=[
                pl.BlockSpec((tb, in_p), lambda i: (i, 0)),       # x: batch-tiled, streamed
                pl.BlockSpec((in_p, hid_p), lambda i: (0, 0)),    # W1: VMEM-resident
                pl.BlockSpec((1, hid_p), lambda i: (0, 0)),       # b1: resident
                pl.BlockSpec((hid_p, out_size), lambda i: (0, 0)),# W2: resident (narrow N)
                pl.BlockSpec((1, out_size), lambda i: (0, 0)),    # b2: resident
            ],
            out_specs=pl.BlockSpec((tb, out_size), lambda i: (i, 0)),
        ),
        compiler_params=pltpu.CompilerParams(
            dimension_semantics=("parallel",),   # batch axis splits across v7x's 2 TCs
            vmem_limit_bytes=vmem_limit,
        ),
    )(xp, w1p, b1p, w2p, b2p)

    # Drop the (at most granule-1) padded rows; identity when B is granule-aligned.
    return out[:B]


def init_params(key, input_size, hidden_size, output_size):
    """Deterministic init mimicking nn.Linear's default U(-1/sqrt(fan_in), +)."""
    k1, k2, k3, k4 = jax.random.split(key, 4)
    bound1 = 1.0 / jnp.sqrt(input_size)
    bound2 = 1.0 / jnp.sqrt(hidden_size)
    w1 = jax.random.uniform(k1, (input_size, hidden_size), jnp.float32, -bound1, bound1)
    b1 = jax.random.uniform(k2, (1, hidden_size), jnp.float32, -bound1, bound1)
    w2 = jax.random.uniform(k3, (hidden_size, output_size), jnp.float32, -bound2, bound2)
    b2 = jax.random.uniform(k4, (1, output_size), jnp.float32, -bound2, bound2)
    return w1, b1, w2, b2


if __name__ == "__main__":
    # Snake-game style Q-net shapes; intentionally not tile-aligned.
    batch, input_size, hidden_size, output_size = 8, 11, 32, 3

    key = jax.random.PRNGKey(0)
    kx, kp = jax.random.split(key)
    x = jax.random.normal(kx, (batch, input_size), jnp.float32)
    w1, b1, w2, b2 = init_params(kp, input_size, hidden_size, output_size)

    # Plain-JAX reference (same math as the PyTorch forward).
    ref = jnp.maximum(x @ w1 + b1, 0.0) @ w2 + b2

    # 1) Exact f32 path (params padded once, reused across calls).
    p_f32 = prepare_params(w1, b1, w2, b2, use_bf16=False)
    out_f32 = jax.block_until_ready(linear_qnet_forward(x, *p_f32))
    assert out_f32.shape == (batch, output_size)
    assert jnp.allclose(out_f32, ref, atol=1e-5, rtol=1e-5)

    # 2) bf16-operand / f32-accumulate path (bandwidth-optimized).
    p_bf16 = prepare_params(w1, b1, w2, b2, use_bf16=True)
    out_bf16 = jax.block_until_ready(linear_qnet_forward(x, *p_bf16))
    assert out_bf16.shape == (batch, output_size)
    assert jnp.allclose(out_bf16, ref, atol=2e-2, rtol=2e-2)

    # 3) Larger ragged batch: multi-step grid (2 TCs on v7x) + partial tail block.
    batch2 = 37
    x2 = jax.random.normal(kx, (batch2, input_size), jnp.float32)
    ref2 = jnp.maximum(x2 @ w1 + b1, 0.0) @ w2 + b2
    out2 = jax.block_until_ready(linear_qnet_forward(x2, *p_f32))
    assert out2.shape == (batch2, output_size)
    assert jnp.allclose(out2, ref2, atol=1e-5, rtol=1e-5)

    print("KERNEL_OK")
</pallas_src>

<mosaic_0001>
module attributes {stable_mosaic.version = 11 : i64} {
  func.func @_qnet_kernel(%arg0: i32, %arg1: memref<8x16xf32, #tpu.memory_space<vmem>>, %arg2: memref<16x128xf32, #tpu.memory_space<vmem>>, %arg3: memref<1x128xf32, #tpu.memory_space<vmem>>, %arg4: memref<128x3xf32, #tpu.memory_space<vmem>>, %arg5: memref<1x3xf32, #tpu.memory_space<vmem>>, %arg6: memref<8x3xf32, #tpu.memory_space<vmem>>) attributes {dimension_semantics = [#tpu.dimension_semantics<parallel>], iteration_bounds = array<i64: 1>, scalar_prefetch = 0 : i64, scratch_operands = 0 : i64, tpu.core_type = #tpu.core_type<tc>, window_params = [{transform_indices = @transform_0, window_bounds = array<i64: 8, 16>}, {pipeline_mode = #tpu.pipeline_mode<synchronous>, transform_indices = @transform_1, window_bounds = array<i64: 16, 128>}, {pipeline_mode = #tpu.pipeline_mode<synchronous>, transform_indices = @transform_2, window_bounds = array<i64: 1, 128>}, {pipeline_mode = #tpu.pipeline_mode<synchronous>, transform_indices = @transform_3, window_bounds = array<i64: 128, 3>}, {pipeline_mode = #tpu.pipeline_mode<synchronous>, transform_indices = @transform_4, window_bounds = array<i64: 1, 3>}, {transform_indices = @transform_5, window_bounds = array<i64: 8, 3>}]} {
    %c0 = arith.constant 0 : index
    %c0_0 = arith.constant 0 : index
    %0 = vector.load %arg1[%c0, %c0_0] : memref<8x16xf32, #tpu.memory_space<vmem>>, vector<8x16xf32>
    %c0_1 = arith.constant 0 : index
    %c0_2 = arith.constant 0 : index
    %1 = vector.load %arg2[%c0_1, %c0_2] : memref<16x128xf32, #tpu.memory_space<vmem>>, vector<16x128xf32>
    %cst = arith.constant dense<0.000000e+00> : vector<8x128xf32>
    %2 = tpu.matmul %0, %1, %cst {dimension_numbers = #tpu.dot_dimension_numbers<[1], [0], [0], [1], [0, 0, 1, 1], [], []>} : vector<8x16xf32>, vector<16x128xf32>, vector<8x128xf32> -> vector<8x128xf32>
    %c0_3 = arith.constant 0 : index
    %c0_4 = arith.constant 0 : index
    %3 = vector.load %arg3[%c0_3, %c0_4] : memref<1x128xf32, #tpu.memory_space<vmem>>, vector<1x128xf32>
    %4 = vector.broadcast %3 : vector<1x128xf32> to vector<8x128xf32>
    %5 = arith.addf %2, %4 : vector<8x128xf32>
    %cst_5 = arith.constant 0.000000e+00 : f32
    %6 = vector.broadcast %cst_5 : f32 to vector<8x128xf32>
    %7 = arith.maximumf %5, %6 : vector<8x128xf32>
    %c0_6 = arith.constant 0 : index
    %c0_7 = arith.constant 0 : index
    %8 = vector.load %arg4[%c0_6, %c0_7] : memref<128x3xf32, #tpu.memory_space<vmem>>, vector<128x3xf32>
    %cst_8 = arith.constant dense<0.000000e+00> : vector<8x3xf32>
    %9 = tpu.matmul %7, %8, %cst_8 {dimension_numbers = #tpu.dot_dimension_numbers<[1], [0], [0], [1], [0, 0, 1, 1], [], []>} : vector<8x128xf32>, vector<128x3xf32>, vector<8x3xf32> -> vector<8x3xf32>
    %c0_9 = arith.constant 0 : index
    %c0_10 = arith.constant 0 : index
    %10 = vector.load %arg5[%c0_9, %c0_10] : memref<1x3xf32, #tpu.memory_space<vmem>>, vector<1x3xf32>
    %11 = vector.broadcast %10 : vector<1x3xf32> to vector<8x3xf32>
    %12 = arith.addf %9, %11 : vector<8x3xf32>
    %c0_11 = arith.constant 0 : index
    %c0_12 = arith.constant 0 : index
    %13 = vector.load %arg6[%c0_11, %c0_12] : memref<8x3xf32, #tpu.memory_space<vmem>>, vector<8x3xf32>
    tpu.vector_store %arg6[%c0_11, %c0_12], %12 {strides = array<i32>} : memref<8x3xf32, #tpu.memory_space<vmem>>, vector<8x3xf32>,
    return
  }
  func.func @transform_0(%arg0: i32) -> (i32, i32) {
    %c0_i32 = arith.constant 0 : i32
    %c0_i32_0 = arith.constant 0 : i32
    return %arg0, %c0_i32 : i32, i32
  }
  func.func @transform_1(%arg0: i32) -> (i32, i32) {
    %c0_i32 = arith.constant 0 : i32
    %c0_i32_0 = arith.constant 0 : i32
    %c0_i32_1 = arith.constant 0 : i32
    return %c0_i32, %c0_i32_0 : i32, i32
  }
  func.func @transform_2(%arg0: i32) -> (i32, i32) {
    %c0_i32 = arith.constant 0 : i32
    %c0_i32_0 = arith.constant 0 : i32
    %c0_i32_1 = arith.constant 0 : i32
    return %c0_i32, %c0_i32_0 : i32, i32
  }
  func.func @transform_3(%arg0: i32) -> (i32, i32) {
    %c0_i32 = arith.constant 0 : i32
    %c0_i32_0 = arith.constant 0 : i32
    %c0_i32_1 = arith.constant 0 : i32
    return %c0_i32, %c0_i32_0 : i32, i32
  }
  func.func @transform_4(%arg0: i32) -> (i32, i32) {
    %c0_i32 = arith.constant 0 : i32
    %c0_i32_0 = arith.constant 0 : i32
    %c0_i32_1 = arith.constant 0 : i32
    return %c0_i32, %c0_i32_0 : i32, i32
  }
  func.func @transform_5(%arg0: i32) -> (i32, i32) {
    %c0_i32 = arith.constant 0 : i32
    %c0_i32_0 = arith.constant 0 : i32
    return %arg0, %c0_i32 : i32, i32
  }
}

</mosaic_0001>

<bundles_post_ra>
// kernel: linear_qnet_forward.1
= control target key start
LH: loop header
LB: loop body
LE: loop exit
PB: predicated region body
PF: predicated region fallthrough
CT: control target
= control target key end

     0   :  { %vm27_vm0 = vcmask 130048   ;;  %vm92_vm1 = vcmask 23552   ;;  %s197_s1 = inlined_call_operand.vmem [shape: f32[16,128], index: 1, kind: input, shape index: {}]   ;;  %s198_s0 = inlined_call_operand.vmem [shape: f32[8,16], index: 0, kind: input, shape index: {}]   ;;  %s199_s3 = inlined_call_operand.vmem [shape: f32[128,3], index: 3, kind: input, shape index: {}]   ;;  %s200_s2 = inlined_call_operand.vmem [shape: f32[1,128], index: 2, kind: input, shape index: {}]   ;;  %s201_s4 = inlined_call_operand.vmem [shape: f32[1,3], index: 4, kind: input, shape index: {}]   ;;  %s202_s5 = inlined_call_operand.vmem [shape: f32[8,3], index: 5, kind: output, shape index: {}]  }
   0x1   :  { %v22_v0 = vld [vmem:[%s197_s1 + $0x8] sm:$0xff]  ;;  %v21_v1 = vld [vmem:[%s197_s1] sm:$0xff]  ;;  %v67_v3 = vld [vmem:[%s199_s3 + $0x78] sm:$0xff] }
   0x2   :  { %45 = vmatpush.msra.mxu0 %v22_v0  ;;  %v20_v2 = vld [vmem:[%s198_s0] sm:$0xff]  ;;  %v66_v4 = vld [vmem:[%s199_s3 + $0x70] sm:$0xff]  ;;  %72 = vmatpush.msra.mxu1 %v67_v3  ;;  %v65_v5 = vld [vmem:[%s199_s3 + $0x68] sm:$0xff] }
   0x3   :  { %v64_v6 = vld [vmem:[%s199_s3 + $0x60] sm:$0xff]  ;;  %v63_v7 = vld [vmem:[%s199_s3 + $0x58] sm:$0xff]  ;;  %v62_v8 = vld [vmem:[%s199_s3 + $0x50] sm:$0xff] }
   0x4   :  { %46 = vmatpush.msra.mxu0 %v21_v1  ;;  %73 = vmatpush.msra.mxu1 %v66_v4  ;;  %v61_v9 = vld [vmem:[%s199_s3 + $0x48] sm:$0xff]  ;;  %v60_v10 = vld [vmem:[%s199_s3 + $0x40] sm:$0xff]  ;;  %v59_v11 = vld [vmem:[%s199_s3 + $0x38] sm:$0xff] }
   0x5   :  { %98 = vmatmul.msk.f32.vlgmr.msra.gmra.mxu0 %vm27_vm0, %v20_v2  ;;  %v58_v12 = vld [vmem:[%s199_s3 + $0x30] sm:$0xff]  ;;  %v57_v13 = vld [vmem:[%s199_s3 + $0x28] sm:$0xff]  ;;  %v56_v14 = vld [vmem:[%s199_s3 + $0x20] sm:$0xff] }
   0x6   :  { %74 = vmatpush.msra.mxu1 %v65_v5  ;;  %v55_v15 = vld [vmem:[%s199_s3 + $0x18] sm:$0xff]  ;;  %v54_v16 = vld [vmem:[%s199_s3 + $0x10] sm:$0xff]  ;;  %v53_v17 = vld [vmem:[%s199_s3 + $0x8] sm:$0xff] }
   0x7   :  { %v52_v18 = vld [vmem:[%s199_s3] sm:$0xff] }
   0x8   :  { %75 = vmatpush.msra.mxu1 %v64_v6  ;;  %v99_v19 = vld [vmem:[%s200_s2] ss:$0 sm:$0xff] }
   0x9   :  { %v100_v23 = vld [vmem:[%s201_s4] ss:$0 sm:$0xff] }
   0xa   :  { %76 = vmatpush.msra.mxu1 %v63_v7 }
   0xc   :  { %77 = vmatpush.msra.mxu1 %v62_v8 }
   0xe   :  { %78 = vmatpush.msra.mxu1 %v61_v9 }
  0x10   :  { %79 = vmatpush.msra.mxu1 %v60_v10 }
  0x12   :  { %80 = vmatpush.msra.mxu1 %v59_v11 }
  0x14   :  { %81 = vmatpush.msra.mxu1 %v58_v12 }
  0x16   :  { %82 = vmatpush.msra.mxu1 %v57_v13 }
  0x18   :  { %83 = vmatpush.msra.mxu1 %v56_v14 }
  0x1a   :  { %84 = vmatpush.msra.mxu1 %v55_v15 }
  0x1c   :  { %85 = vmatpush.msra.mxu1 %v54_v16 }
  0x1e   :  { %86 = vmatpush.msra.mxu1 %v53_v17 }
  0x20   :  { %87 = vmatpush.msra.mxu1 %v52_v18 }
  0x82   :  { %v48_v20 = vpop.f32.mrf.mxu0 }
  0x83   :  { %v49_v21 = vadd.f32 %v99_v19, %v48_v20 }
  0x85   :  { %v51_v22 = vmax.f32 %v49_v21, 0.0 }
  0x87   :  { %88 = vmatmul.f32.vlgmr.msra.gmra.mxu1 %v51_v22 }
 0x104   :  { %v89_v24 = vpop.f32.mrf.mxu1 }
 0x105   :  { %v90_v25 = vadd.f32 %v100_v23, %v89_v24 }
 0x107   :  { %93 = vst.msk [vmem:[%s202_s5] sm:$0xff] %vm92_vm1, %v90_v25 }

</bundles_post_ra>
